<compile_context>
chip_gen: v5e
topology: v5e:2x2
jax: 0.10.0
libtpu: 0.0.40
codegen_flags: <defaults>
</compile_context>

<pallas_src>
import math

import numpy as np

import jax
import jax.numpy as jnp
from jax.experimental import pallas as pl
from jax.experimental.pallas import tpu as pltpu


# ---------------------------------------------------------------------------
# calculate_theta2 without sympy/scipy: expand (x/2)^i (1-x/2)^(d-i) / B(i+1,d+1-i)
# ---------------------------------------------------------------------------
def calculate_theta2(d):
    thetas = []
    for i in range(d + 1):
        coeffs = [0.0] * (d + 1)  # coeffs[k] = coefficient of x^k
        for j in range(d - i + 1):
            p = i + j
            coeffs[p] += math.comb(d - i, j) * ((-1.0) ** j) * (0.5 ** p)
        beta = math.gamma(i + 1) * math.gamma(d + 1 - i) / math.gamma(d + 2)
        thetas.append([c / beta for c in coeffs])
    return thetas


# ---------------------------------------------------------------------------
# small host helpers
# ---------------------------------------------------------------------------
def _ceil_to(x, m):
    return ((x + m - 1) // m) * m


def _vmem_limit_bytes():
    """Generation-aware VMEM limit (~0.85 x physical)."""
    try:
        cap = pltpu.get_tpu_info().vmem_capacity_bytes
    except Exception:
        cap = 64 * 1024 * 1024  # conservative (v7x-sized) fallback
    return int(0.85 * cap)


def _pad_and_tiles(n, tile_override=None):
    """Pad N so large aligned tiles divide it; pick (row tile tm, contraction tile tc)."""
    if n <= 512:
        n_pad = _ceil_to(n, 128)
    else:
        n_pad = _ceil_to(n, 512)
    if tile_override is not None:
        tm, tc = tile_override
    elif n_pad <= 512:
        tm = tc = n_pad
    else:
        tm = 512
        tc = 1024 if n_pad % 1024 == 0 else 512
    assert n_pad % tm == 0 and n_pad % tc == 0, (n_pad, tm, tc)
    return n_pad, tm, tc


# ---------------------------------------------------------------------------
# Kernel 1 (prologue, column-tiled, embarrassingly parallel):
#   h^T = relu(W1^T x^T + b1^T)      -- lane-dense [H, tile] layout
# ---------------------------------------------------------------------------
def _prologue_kernel(xT_ref, w1t_ref, b1t_ref, hT_ref):
    h = jnp.dot(w1t_ref[...], xT_ref[...], preferred_element_type=jnp.float32)
    hT_ref[...] = jnp.maximum(h + b1t_ref[...], 0.0)


# ---------------------------------------------------------------------------
# Degenerate d = 0 path (no Laplacian steps): out^T = W2_eff[0]^T h^T + b2^T
# ---------------------------------------------------------------------------
def _k0_kernel(hT_ref, w2t0_ref, b2t_ref, o_ref):
    o_ref[...] = (
        jnp.dot(w2t0_ref[...], hT_ref[...], preferred_element_type=jnp.float32)
        + b2t_ref[...]
    )


# ---------------------------------------------------------------------------
# Kernel 2: K-1 Laplacian power steps + all linear2 projections, fused.
#
# grid = (K-1, n/tm row tiles, n/tc contraction tiles), contraction innermost.
#   p_{kk+1}^T[:, m] = p_kk^T[:, m] - sum_c p_kk^T[:, c] @ A^T[c, m]
#   out^T[:, m]      = b2^T + sum_k W2_eff[k]^T @ p_k^T[:, m]   (accumulated in place)
#
# p_k lives in a ping-pong VMEM scratch (2, H, n) indexed by kk & 1; the output is a
# single resident (H, n) block (constant index_map) written back to HBM once.
# A^T is either VMEM-resident (copied once) or streamed as (tc, tm) blocks.
# ---------------------------------------------------------------------------
def _make_poly_kernel(tm, tc, resident):
    def kernel(hT_hbm, a_in, w2t_ref, b2t_ref, o_ref, p_ref, acc_ref, *rest):
        kk = pl.program_id(0)            # Laplacian step index (computes p_{kk+1})
        m = pl.program_id(1)             # node (output) tile
        c = pl.program_id(2)             # contraction tile
        nc = pl.num_programs(2)

        m_off = pl.multiple_of(m * tm, tm)
        c_off = pl.multiple_of(c * tc, tc)

        slot = kk & 1
        src = p_ref.at[slot]             # p_kk      view, (H, n_pad)
        dst = p_ref.at[1 - slot]         # p_{kk+1}  view

        # One-time setup at the very first grid step:
        #   - DMA h^T (= p_0) from HBM into ping-pong slot 0,
        #   - DMA the whole normalized adjacency into VMEM when resident.
        @pl.when((kk == 0) & (m == 0) & (c == 0))
        def _():
            pltpu.sync_copy(hT_hbm, p_ref.at[0])
            if resident:
                pltpu.sync_copy(a_in, rest[0])

        # Initialize the resident output block: bias + k = 0 projection.
        @pl.when((kk == 0) & (c == 0))
        def _():
            o_ref[:, pl.ds(m_off, tm)] = b2t_ref[...] + jnp.dot(
                w2t_ref[0], src[:, pl.ds(m_off, tm)],
                preferred_element_type=jnp.float32)

        # Reset the contraction accumulator for this (kk, m) tile.
        @pl.when(c == 0)
        def _():
            acc_ref[...] = jnp.zeros_like(acc_ref)

        # Contraction step: acc += p_kk^T[:, c_tile] @ A^T[c_tile, m_tile]
        # (MXU fed in A's dtype -- bf16 in the fast path -- f32 accumulation).
        if resident:
            a_tile = rest[0][pl.ds(c_off, tc), pl.ds(m_off, tm)]
        else:
            a_tile = a_in[...]
        acc_ref[...] += jnp.dot(
            src[:, pl.ds(c_off, tc)].astype(a_tile.dtype), a_tile,
            preferred_element_type=jnp.float32)

        # Epilogue for this (kk, m) tile: finish the Laplacian step (f32 residual
        # subtract), store p_{kk+1} into the other ping-pong slot and fold the
        # projection through W2_eff[kk + 1] into the resident output block.
        @pl.when(c == nc - 1)
        def _():
            p_new = src[:, pl.ds(m_off, tm)] - acc_ref[...]
            dst[:, pl.ds(m_off, tm)] = p_new
            o_ref[:, pl.ds(m_off, tm)] += jnp.dot(
                w2t_ref[kk + 1], p_new, preferred_element_type=jnp.float32)

    return kernel


# ---------------------------------------------------------------------------
# Host wrapper
# ---------------------------------------------------------------------------
def encoder_forward(x, a_norm, w1, b1, w2, b2, thetas, h_feats, *,
                    compute_dtype=jnp.bfloat16, force_stream=False,
                    tile_override=None):
    n, in_feats = x.shape
    K = len(thetas)
    H = h_feats

    # ---- host-side precompute: fold theta into W2, lane-dense transposed layout ----
    theta_mat = jnp.asarray(thetas, dtype=jnp.float32)                      # [K, K]
    w2_eff = jnp.einsum("ik,iab->kab", theta_mat,
                        jnp.asarray(w2, jnp.float32).reshape(K, H, H))      # [K, H, H]
    w2_eff_t = jnp.swapaxes(w2_eff, 1, 2)                                   # W2_eff^T

    n_pad, tm, tc = _pad_and_tiles(n, tile_override)

    xT = jnp.zeros((in_feats, n_pad), jnp.float32)
    xT = xT.at[:, :n].set(jnp.asarray(x, jnp.float32).T)                    # [F, N_pad]
    w1t = jnp.asarray(w1, jnp.float32).T                                    # [H, F]
    b1t = jnp.asarray(b1, jnp.float32).reshape(H, 1)                        # [H, 1]
    b2t = jnp.asarray(b2, jnp.float32).reshape(H, 1)                        # [H, 1]
    aT = jnp.zeros((n_pad, n_pad), jnp.float32)
    aT = aT.at[:n, :n].set(jnp.asarray(a_norm, jnp.float32).T)              # [N, N] padded
    aT = aT.astype(compute_dtype)

    vmem_limit = _vmem_limit_bytes()

    # ---- kernel 1: linear1 + ReLU (lane-dense h^T) ----
    hT = pl.pallas_call(
        _prologue_kernel,
        out_shape=jax.ShapeDtypeStruct((H, n_pad), jnp.float32),
        grid=(n_pad // tm,),
        in_specs=[pl.BlockSpec((in_feats, tm), lambda j: (0, j)),
                  pl.BlockSpec((H, in_feats), lambda j: (0, 0)),
                  pl.BlockSpec((H, 1), lambda j: (0, 0))],
        out_specs=pl.BlockSpec((H, tm), lambda j: (0, j)),
        compiler_params=pltpu.CompilerParams(
            dimension_semantics=("parallel",),
            vmem_limit_bytes=vmem_limit),
    )(xT, w1t, b1t)

    if K == 1:  # d = 0: no Laplacian steps, just the k = 0 projection + bias
        outT = pl.pallas_call(
            _k0_kernel,
            out_shape=jax.ShapeDtypeStruct((H, n_pad), jnp.float32),
            grid=(n_pad // tm,),
            in_specs=[pl.BlockSpec((H, tm), lambda j: (0, j)),
                      pl.BlockSpec((H, H), lambda j: (0, 0)),
                      pl.BlockSpec((H, 1), lambda j: (0, 0))],
            out_specs=pl.BlockSpec((H, tm), lambda j: (0, j)),
            compiler_params=pltpu.CompilerParams(
                dimension_semantics=("parallel",),
                vmem_limit_bytes=vmem_limit),
        )(hT, w2_eff_t[0], b2t)
        return outT.T[:n]

    # ---- residency decision for A^T (generation-specific via vmem_limit) ----
    item = jnp.dtype(compute_dtype).itemsize
    fixed_vmem = (2 * H * n_pad * 4        # ping-pong p_k scratch
                  + 2 * H * n_pad * 4      # resident output block (double-buffer bound)
                  + H * tm * 4             # contraction accumulator
                  + 2 * K * H * H * 4      # W2_eff^T
                  + 2 * H * 4              # b2^T
                  + (2 << 20))             # headroom for Mosaic internals
    a_bytes = n_pad * n_pad * item
    resident = (not force_stream) and (fixed_vmem + a_bytes <= vmem_limit - (2 << 20))

    if resident:
        a_spec = pl.BlockSpec(memory_space=pl.ANY)     # raw HBM ref, copied once
        scratch = [pltpu.VMEM((2, H, n_pad), jnp.float32),   # p_k ping-pong
                   pltpu.VMEM((H, tm), jnp.float32),          # contraction accumulator
                   pltpu.VMEM((n_pad, n_pad), compute_dtype)]  # resident A^T
    else:
        a_idx = lambda kk, m, c: (c, m)
        try:
            a_spec = pl.BlockSpec((tc, tm), a_idx, pipeline_mode=pl.Buffered(3))
        except TypeError:   # older BlockSpec without pipeline_mode: default 2 buffers
            a_spec = pl.BlockSpec((tc, tm), a_idx)
        scratch = [pltpu.VMEM((2, H, n_pad), jnp.float32),
                   pltpu.VMEM((H, tm), jnp.float32)]

    # ---- kernel 2: Laplacian power loop + fused linear2 ----
    outT = pl.pallas_call(
        _make_poly_kernel(tm, tc, resident),
        out_shape=jax.ShapeDtypeStruct((H, n_pad), jnp.float32),
        grid=(K - 1, n_pad // tm, n_pad // tc),
        in_specs=[pl.BlockSpec(memory_space=pl.ANY),                     # h^T in HBM
                  a_spec,                                                # A^T
                  pl.BlockSpec((K, H, H), lambda kk, m, c: (0, 0, 0)),   # W2_eff^T
                  pl.BlockSpec((H, 1), lambda kk, m, c: (0, 0))],        # b2^T
        out_specs=pl.BlockSpec((H, n_pad), lambda kk, m, c: (0, 0)),     # resident out
        scratch_shapes=scratch,
        compiler_params=pltpu.CompilerParams(
            # All axes sequential on one core: the ping-pong p_k scratch and the
            # resident output carry cross-tile / cross-step dependences.
            dimension_semantics=("arbitrary", "arbitrary", "arbitrary"),
            vmem_limit_bytes=vmem_limit),
    )(hT, aT, w2_eff_t, b2t)

    return outT.T[:n]   # back to the module's [N, H] layout (cheap wrapper transpose)


# ---------------------------------------------------------------------------
# float64 numpy reference (mirrors the PyTorch forward exactly)
# ---------------------------------------------------------------------------
def encoder_ref_np(x, a_norm, w1, b1, w2, b2, thetas):
    K = len(thetas)
    h = np.maximum(x @ w1 + b1, 0.0)
    powers = [h]
    feat = h
    for _ in range(1, K):
        feat = feat - a_norm @ feat
        powers.append(feat)
    hs = []
    for i in range(K):
        hi = thetas[i][0] * powers[0]
        for k in range(1, K):
            hi = hi + thetas[i][k] * powers[k]
        hs.append(hi)
    feats_final = np.concatenate(hs, axis=-1)
    return feats_final @ w2 + b2


def _check(out, ref, rtol, atol, name):
    diff = np.abs(np.asarray(out, np.float64) - ref)
    tol = atol + rtol * np.abs(ref)
    assert np.all(diff <= tol), f"{name}: max abs err {diff.max():.3e}"


if __name__ == "__main__":
    # Small synthetic problem, shapes consistent with the module.
    N, IN_FEATS, H_FEATS, D = 256, 16, 32, 2
    thetas = calculate_theta2(D)
    K = len(thetas)  # = D + 1

    key = jax.random.PRNGKey(0)
    kx, ka, kw1, kb1, kw2, kb2 = jax.random.split(key, 6)

    # Node features
    x = jax.random.normal(kx, (N, IN_FEATS), dtype=jnp.float32)

    # Deterministic synthetic undirected graph -> dense normalized adjacency
    r = jax.random.uniform(ka, (N, N))
    adj = (r < 0.05).astype(jnp.float32)
    adj = jnp.maximum(adj, adj.T)                      # symmetrize
    adj = adj * (1.0 - jnp.eye(N, dtype=jnp.float32))  # no self loops
    in_deg = jnp.maximum(adj.sum(axis=0), 1.0)         # in_degrees, clamp(min=1)
    d_inv = in_deg ** -0.5
    a_norm = d_inv[:, None] * adj.T * d_inv[None, :]   # D^-1/2 A^T D^-1/2

    # Deterministic parameter init (nn.Linear shapes; stored pre-transposed [in, out])
    w1 = jax.random.normal(kw1, (IN_FEATS, H_FEATS), dtype=jnp.float32) * 0.1
    b1 = jax.random.normal(kb1, (1, H_FEATS), dtype=jnp.float32) * 0.1
    w2 = jax.random.normal(kw2, (H_FEATS * K, H_FEATS), dtype=jnp.float32) * 0.1
    b2 = jax.random.normal(kb2, (1, H_FEATS), dtype=jnp.float32) * 0.1

    # Ground truth in float64 numpy.
    ref = encoder_ref_np(np.asarray(x, np.float64), np.asarray(a_norm, np.float64),
                         np.asarray(w1, np.float64), np.asarray(b1, np.float64),
                         np.asarray(w2, np.float64), np.asarray(b2, np.float64),
                         thetas)

    # 1) f32 path, A^T VMEM-resident (default tiling).
    out_f32 = jax.block_until_ready(
        encoder_forward(x, a_norm, w1, b1, w2, b2, thetas, H_FEATS,
                        compute_dtype=jnp.float32))
    assert out_f32.shape == (N, H_FEATS)
    _check(out_f32, ref, rtol=1e-2, atol=1e-2, name="f32 resident")

    # 2) bf16 A, A^T VMEM-resident (the production fast path at this size).
    out_bf16 = jax.block_until_ready(
        encoder_forward(x, a_norm, w1, b1, w2, b2, thetas, H_FEATS,
                        compute_dtype=jnp.bfloat16))
    assert out_bf16.shape == (N, H_FEATS)
    _check(out_bf16, ref, rtol=5e-2, atol=5e-2, name="bf16 resident")

    # 3) Correctness-only configuration: forced A streaming with small tiles to
    #    exercise the multi-tile (m, c) grid and the streamed BlockSpec path.
    #    Production uses the default large tiles + residency decided by VMEM budget.
    out_stream = jax.block_until_ready(
        encoder_forward(x, a_norm, w1, b1, w2, b2, thetas, H_FEATS,
                        compute_dtype=jnp.bfloat16, force_stream=True,
                        tile_override=(128, 128)))
    assert out_stream.shape == (N, H_FEATS)
    _check(out_stream, ref, rtol=5e-2, atol=5e-2, name="bf16 streamed")

    print("KERNEL_OK")
</pallas_src>

<mosaic_0001>
module attributes {stable_mosaic.version = 11 : i64} {
  func.func @_prologue_kernel(%arg0: i32, %arg1: memref<16x256xf32, #tpu.memory_space<vmem>>, %arg2: memref<32x16xf32, #tpu.memory_space<vmem>>, %arg3: memref<32x1xf32, #tpu.memory_space<vmem>>, %arg4: memref<32x256xf32, #tpu.memory_space<vmem>>) attributes {dimension_semantics = [#tpu.dimension_semantics<parallel>], iteration_bounds = array<i64: 1>, scalar_prefetch = 0 : i64, scratch_operands = 0 : i64, tpu.core_type = #tpu.core_type<tc>, window_params = [{transform_indices = @transform_0, window_bounds = array<i64: 16, 256>}, {pipeline_mode = #tpu.pipeline_mode<synchronous>, transform_indices = @transform_1, window_bounds = array<i64: 32, 16>}, {pipeline_mode = #tpu.pipeline_mode<synchronous>, transform_indices = @transform_2, window_bounds = array<i64: 32, 1>}, {transform_indices = @transform_3, window_bounds = array<i64: 32, 256>}]} {
    %c0 = arith.constant 0 : index
    %c0_0 = arith.constant 0 : index
    %0 = vector.load %arg2[%c0, %c0_0] : memref<32x16xf32, #tpu.memory_space<vmem>>, vector<32x16xf32>
    %c0_1 = arith.constant 0 : index
    %c0_2 = arith.constant 0 : index
    %1 = vector.load %arg1[%c0_1, %c0_2] : memref<16x256xf32, #tpu.memory_space<vmem>>, vector<16x256xf32>
    %cst = arith.constant dense<0.000000e+00> : vector<32x256xf32>
    %2 = tpu.matmul %0, %1, %cst {dimension_numbers = #tpu.dot_dimension_numbers<[1], [0], [0], [1], [0, 0, 1, 1], [], []>} : vector<32x16xf32>, vector<16x256xf32>, vector<32x256xf32> -> vector<32x256xf32>
    %c0_3 = arith.constant 0 : index
    %c0_4 = arith.constant 0 : index
    %3 = vector.load %arg3[%c0_3, %c0_4] : memref<32x1xf32, #tpu.memory_space<vmem>>, vector<32x1xf32>
    %4 = vector.broadcast %3 : vector<32x1xf32> to vector<32x256xf32>
    %5 = arith.addf %2, %4 : vector<32x256xf32>
    %cst_5 = arith.constant 0.000000e+00 : f32
    %6 = vector.broadcast %cst_5 : f32 to vector<32x256xf32>
    %7 = arith.maximumf %5, %6 : vector<32x256xf32>
    %c0_6 = arith.constant 0 : index
    %c0_7 = arith.constant 0 : index
    %8 = vector.load %arg4[%c0_6, %c0_7] : memref<32x256xf32, #tpu.memory_space<vmem>>, vector<32x256xf32>
    tpu.vector_store %arg4[%c0_6, %c0_7], %7 {strides = array<i32>} : memref<32x256xf32, #tpu.memory_space<vmem>>, vector<32x256xf32>,
    return
  }
  func.func @transform_0(%arg0: i32) -> (i32, i32) {
    %c0_i32 = arith.constant 0 : i32
    %c0_i32_0 = arith.constant 0 : i32
    return %c0_i32, %arg0 : i32, i32
  }
  func.func @transform_1(%arg0: i32) -> (i32, i32) {
    %c0_i32 = arith.constant 0 : i32
    %c0_i32_0 = arith.constant 0 : i32
    %c0_i32_1 = arith.constant 0 : i32
    return %c0_i32, %c0_i32_0 : i32, i32
  }
  func.func @transform_2(%arg0: i32) -> (i32, i32) {
    %c0_i32 = arith.constant 0 : i32
    %c0_i32_0 = arith.constant 0 : i32
    %c0_i32_1 = arith.constant 0 : i32
    return %c0_i32, %c0_i32_0 : i32, i32
  }
  func.func @transform_3(%arg0: i32) -> (i32, i32) {
    %c0_i32 = arith.constant 0 : i32
    %c0_i32_0 = arith.constant 0 : i32
    return %c0_i32, %arg0 : i32, i32
  }
}

</mosaic_0001>

<bundles_post_ra>
// kernel: tpu_custom_call.1
= control target key start
LH: loop header
LB: loop body
LE: loop exit
PB: predicated region body
PF: predicated region fallthrough
CT: control target
= control target key end

     0   :  { %vm47_vm0 = vcmask 130048   ;;  %s267_s0 = inlined_call_operand.vmem [shape: f32[16,256], index: 0, kind: input, shape index: {}]   ;;  %s268_s1 = inlined_call_operand.vmem [shape: f32[32,16], index: 1, kind: input, shape index: {}]   ;;  %s269_s2 = inlined_call_operand.vmem [shape: f32[32,1], index: 2, kind: input, shape index: {}]   ;;  %s270_s3 = inlined_call_operand.hbm [shape: f32[32,256], index: 3, kind: output, shape index: {}]  }
   0x1   :  { %v21_v0 = vld [vmem:[%s267_s0 + $0x10] sm:$0xff]  ;;  %v22_v1 = vld [vmem:[%s267_s0 + $0x18] sm:$0xff]  ;;  %v19_v2 = vld [vmem:[%s267_s0] sm:$0xff] }
   0x2   :  { %74 = vmatpush.msra.mxu0 %v21_v0  ;;  %160 = vmatpush.msra.mxu2 %v21_v0  ;;  %v20_v3 = vld [vmem:[%s267_s0 + $0x8] sm:$0xff]  ;;  %v15_v4 = vld [vmem:[%s268_s1] sm:$0xff]  ;;  %v17_v5 = vld [vmem:[%s268_s1 + $0x10] sm:$0xff] }
   0x3   :  { %103 = vmatpush.msra.mxu1 %v22_v1  ;;  %162 = vmatpush.msra.mxu3 %v22_v1 }
   0x4   :  { %75 = vmatpush.msra.mxu0 %v19_v2  ;;  %161 = vmatpush.msra.mxu2 %v19_v2 }
   0x5   :  { %104 = vmatpush.msra.mxu1 %v20_v3  ;;  %163 = vmatpush.msra.mxu3 %v20_v3 }
   0x6   :  { %8 = vsyncpa [#allocation3], 0  ;;  %152 = vmatmul.msk.f32.vlgmr.msra.gmra.mxu0 %vm47_vm0, %v15_v4  ;;  %154 = vmatmul.msk.f32.vlgmr.msra.gmra.mxu2 %vm47_vm0, %v17_v5  ;;  %v25_v6 = vld [vmem:[%s269_s2 + $0x10] sm:$0xff]  ;;  %v23_v7 = vld [vmem:[%s269_s2] sm:$0xff]  ;;  %v196_v8 = vmov 0   ;;  %s140_s10 = sshll.u32 %s270_s3, 4  ;;  %s141_s10 = int_to_ptr.hbm [resolvable:$true] %s140_s10 }
   0x7   :  { %156 = vmatmul.msk.f32.vlgmr.msra.gmra.mxu1 %vm47_vm0, %v15_v4  ;;  %158 = vmatmul.msk.f32.vlgmr.msra.gmra.mxu3 %vm47_vm0, %v17_v5  ;;  %v16_v9 = vld [vmem:[%s268_s1 + $0x8] sm:$0xff]  ;;  %v18_v10 = vld [vmem:[%s268_s1 + $0x18] sm:$0xff]  ;;  %s197_s1 = smov [#allocation2]   ;;  %s198_s11 = smov 256  }
   0x8   :  { %169 = vset.pattern.permute.xlu1 %v196_v8  ;;  %168 = vset.pattern.permute.xlu0 %v196_v8  ;;  %v26_v11 = vld [vmem:[%s269_s2 + $0x18] sm:$0xff]  ;;  %v24_v12 = vld [vmem:[%s269_s2 + $0x8] sm:$0xff]  ;;  %s138_s2 = sshll.u32 %s197_s1, 4  ;;  %s199_s12 = smov 16   ;;  %s139_s2 = int_to_ptr.vmem [resolvable:$true] %s138_s2 }
   0x9   :  { %39 = vperm.xlu1 %169, %v25_v6   ;;  %29 = vperm.xlu0 %168, %v23_v7  }
   0xe   :  { %153 = vmatmul.msk.f32.gmra.mxu0 %vm47_vm0, %v16_v9  ;;  %155 = vmatmul.msk.f32.gmra.mxu2 %vm47_vm0, %v18_v10 }
   0xf   :  { %157 = vmatmul.msk.f32.gmra.mxu1 %vm47_vm0, %v16_v9  ;;  %159 = vmatmul.msk.f32.gmra.mxu3 %vm47_vm0, %v18_v10 }
  0x11   :  { %44 = vperm.xlu1 %169, %v26_v11   ;;  %34 = vperm.xlu0 %168, %v24_v12  }
  0x7b   :  { %v30_v13 = vpop.permute.xlu0 %29  ;;  %v40_v19 = vpop.permute.xlu1 %39 }
  0x83   :  { %v77_v14 = vpop.f32.mrf.mxu0  ;;  %v35_v24 = vpop.permute.xlu0 %34 }
  0x84   :  { %v78_v15 = vadd.f32 %v77_v14, %v30_v13  ;;  %v106_v16 = vpop.f32.mrf.mxu1  ;;  %v45_v34 = vpop.permute.xlu1 %44 }
  0x85   :  { %v107_v17 = vadd.f32 %v106_v16, %v30_v13 }
  0x86   :  { %v118_v18 = vmax.f32 %v78_v15, 0.0 }
  0x87   :  { %v119_v20 = vmax.f32 %v107_v17, 0.0 }
  0x88   :  { %126 = vst [vmem:[#allocation2] sm:$0xff] %v118_v18 }
  0x89   :  { %127 = vst [vmem:[#allocation2 + $0x8] sm:$0xff] %v119_v20  ;;  %v83_v21 = vpop.f32.mrf.mxu2 }
  0x8a   :  { %v84_v22 = vadd.f32 %v83_v21, %v40_v19  ;;  %v112_v23 = vpop.f32.mrf.mxu3 }
  0x8b   :  { %v113_v25 = vadd.f32 %v112_v23, %v40_v19  ;;  %v80_v26 = vpop.f32.mrf.mxu0 }
  0x8c   :  { %v122_v27 = vmax.f32 %v84_v22, 0.0  ;;  %v81_v28 = vadd.f32 %v80_v26, %v35_v24  ;;  %v109_v29 = vpop.f32.mrf.mxu1 }
  0x8d   :  { %v123_v30 = vmax.f32 %v113_v25, 0.0  ;;  %v110_v31 = vadd.f32 %v109_v29, %v35_v24 }
  0x8e   :  { %130 = vst [vmem:[#allocation2 + $0x20] sm:$0xff] %v122_v27  ;;  %v120_v32 = vmax.f32 %v81_v28, 0.0 }
  0x8f   :  { %131 = vst [vmem:[#allocation2 + $0x28] sm:$0xff] %v123_v30  ;;  %v121_v33 = vmax.f32 %v110_v31, 0.0 }
  0x90   :  { %128 = vst [vmem:[#allocation2 + $0x10] sm:$0xff] %v120_v32 }
  0x91   :  { %129 = vst [vmem:[#allocation2 + $0x18] sm:$0xff] %v121_v33  ;;  %v86_v35 = vpop.f32.mrf.mxu2 }
  0x92   :  { %v87_v36 = vadd.f32 %v86_v35, %v45_v34  ;;  %v115_v37 = vpop.f32.mrf.mxu3 }
  0x93   :  { %v116_v38 = vadd.f32 %v115_v37, %v45_v34 }
  0x94   :  { %v124_v39 = vmax.f32 %v87_v36, 0.0 }
  0x95   :  { %v125_v40 = vmax.f32 %v116_v38, 0.0 }
  0x96   :  { %132 = vst [vmem:[#allocation2 + $0x30] sm:$0xff] %v124_v39 }
  0x97   :  { %133 = vst [vmem:[#allocation2 + $0x38] sm:$0xff] %v125_v40 }
  0x98   :  { %146 = dma.vmem_to_hbm [thread:$0]  %s139_s2, 1024, %s141_s10, [#allocation3], %s198_s11, %s198_s11, %s199_s12  }
  0x99   :  { %194 = dma.done.wait [#allocation3], 1024  }
  0x9a   :  { %195 = vsyncadd [#allocation3], 4294966272 }
  0x9b   :  { %151 = vsyncpa [#allocation3], 1 }

</bundles_post_ra>
